<compile_context>
chip_gen: v7x
topology: tpu7x:2x2x1
jax: 0.10.0
libtpu: 0.0.40
codegen_flags: <defaults>
</compile_context>

<pallas_src>
import jax
import jax.numpy as jnp
from jax.experimental import pallas as pl
from jax.experimental.pallas import tpu as pltpu


def gru_kernel(x_ref, h0_ref, wih_ref, whh_ref, bgi_ref, bhn_ref,
               out_ref, hid_ref, gi_ref):
    """Single-shot GRU forward: fused input projection + serial recurrence.

    x_ref   : (T*B, I)   flattened input sequence
    h0_ref  : (1, B, H)  initial hidden state
    wih_ref : (I, 3H)    input weights, columns gate-major r|z|n (== W_ih^T)
    whh_ref : (H, 3H)    recurrent weights, columns gate-major r|z|n (== W_hh^T)
    bgi_ref : (1, 3H)    b_ih with b_hh[r], b_hh[z] folded in (b_hh[n] excluded)
    bhn_ref : (1, H)     b_hh[n] (kept separate: scaled by r per PyTorch GRU)
    out_ref : (T, B, H)  all hidden states (VMEM-resident, one writeback)
    hid_ref : (1, B, H)  final hidden state
    gi_ref  : (T*B, 3H)  f32 VMEM scratch for the precomputed input projection
    """
    T, B, H = out_ref.shape

    # --- Fused input projection: ONE MXU matmul for all timesteps, result ---
    # --- kept resident in VMEM (never touches HBM). --------------------------
    gi_ref[...] = (
        jnp.dot(x_ref[...], wih_ref[...], preferred_element_type=jnp.float32)
        + bgi_ref[...])

    # Hoisted loop-invariants.
    whh = whh_ref[...]                                               # (H, 3H)
    # Pre-broadcast once; broadcast_in_dim is not CSE'd across unrolled bodies.
    b_hn = jnp.broadcast_to(bhn_ref[...].astype(jnp.float32), (B, H))

    def step(t, h):
        off = pl.multiple_of(t * B, B)
        gi_t = gi_ref[pl.ds(off, B), :]                              # (B, 3H)
        # Single recurrent matmul for all three gates (r|z|n on lane axis).
        gh = jnp.dot(h, whh, preferred_element_type=jnp.float32)     # (B, 3H)

        rz = jax.nn.sigmoid(gi_t[:, :2 * H] + gh[:, :2 * H])
        r = rz[:, :H]
        z = rz[:, H:]
        n = jnp.tanh(gi_t[:, 2 * H:] + r * (gh[:, 2 * H:] + b_hn))

        # (1 - z) * n + z * h  ==  n + z * (h - n)   (one fewer VPU op)
        h_new = n + z * (h - n)
        out_ref[t] = h_new.astype(out_ref.dtype)
        return h_new

    h0 = h0_ref[0].astype(jnp.float32)
    h_last = jax.lax.fori_loop(0, T, step, h0, unroll=True)
    hid_ref[0] = h_last.astype(hid_ref.dtype)


def pack_gru_params(w_ih, w_hh, b_ih, b_hh):
    """One-time (outside the per-call jit path) packing of nn.GRU parameters."""
    H = w_hh.shape[1]
    wih_t = jnp.asarray(w_ih).T                                      # (I, 3H)
    whh_t = jnp.asarray(w_hh).T                                      # (H, 3H)
    # Fold b_hh[r], b_hh[z] into the input-projection bias; keep b_hh[n] apart.
    bias_gi = (b_ih + jnp.concatenate(
        [b_hh[:2 * H], jnp.zeros((H,), dtype=b_hh.dtype)])).reshape(1, 3 * H)
    b_hn = b_hh[2 * H:].reshape(1, H)
    return wih_t, whh_t, bias_gi, b_hn


@jax.jit
def encoder_gru_forward(x, h0, wih_t, whh_t, bias_gi, b_hn):
    """x: (T, B, I), h0: (1, B, H). Returns (output (T,B,H), hidden (1,B,H))."""
    T, B, I = x.shape
    H = h0.shape[-1]

    # Leading-dim merge reshape: metadata-only in XLA (no data movement).
    x2d = x.reshape(T * B, I)

    grid_spec = pltpu.PrefetchScalarGridSpec(
        num_scalar_prefetch=0,
        grid=(1,),  # single invocation; whole recurrence lives inside the kernel
        in_specs=[
            pl.BlockSpec((T * B, I), lambda i: (0, 0)),        # x2d
            pl.BlockSpec((1, B, H), lambda i: (0, 0, 0)),      # h0
            pl.BlockSpec((I, 3 * H), lambda i: (0, 0)),        # wih_t
            pl.BlockSpec((H, 3 * H), lambda i: (0, 0)),        # whh_t
            pl.BlockSpec((1, 3 * H), lambda i: (0, 0)),        # bias_gi
            pl.BlockSpec((1, H), lambda i: (0, 0)),            # b_hn
        ],
        out_specs=[
            pl.BlockSpec((T, B, H), lambda i: (0, 0, 0)),      # output
            pl.BlockSpec((1, B, H), lambda i: (0, 0, 0)),      # hidden
        ],
        scratch_shapes=[pltpu.VMEM((T * B, 3 * H), jnp.float32)],
    )

    output, hidden = pl.pallas_call(
        gru_kernel,
        out_shape=(
            jax.ShapeDtypeStruct((T, B, H), x.dtype),
            jax.ShapeDtypeStruct((1, B, H), h0.dtype),
        ),
        grid_spec=grid_spec,
        compiler_params=pltpu.CompilerParams(
            dimension_semantics=("arbitrary",),
            # Guardrail (v7x has 64 MiB physical VMEM): footprint here is
            # ~0.1 MiB; chunk T via a grid axis if this ever approaches the cap.
            vmem_limit_bytes=32 * 1024 * 1024,
        ),
    )(x2d, h0, wih_t, whh_t, bias_gi, b_hn)

    return output, hidden


def gru_reference(x, h0, w_ih, w_hh, b_ih, b_hh):
    """Pure-JAX reference matching torch.nn.GRU (single layer)."""
    H = h0.shape[-1]

    def step(h, x_t):
        gi = x_t @ w_ih.T + b_ih
        gh = h @ w_hh.T + b_hh
        r = jax.nn.sigmoid(gi[:, :H] + gh[:, :H])
        z = jax.nn.sigmoid(gi[:, H:2 * H] + gh[:, H:2 * H])
        n = jnp.tanh(gi[:, 2 * H:] + r * gh[:, 2 * H:])
        h_new = (1.0 - z) * n + z * h
        return h_new, h_new

    h_last, outs = jax.lax.scan(step, h0[0], x)
    return outs, h_last[None]


if __name__ == "__main__":
    # Small shapes consistent with the module: seq=8, batch=8, input=32, hidden=32
    T, B, I, H = 8, 8, 32, 32
    key = jax.random.PRNGKey(0)
    kx, kh, k1, k2, k3, k4 = jax.random.split(key, 6)

    x = jax.random.normal(kx, (T, B, I), dtype=jnp.float32)
    h0 = jax.random.normal(kh, (1, B, H), dtype=jnp.float32)

    # PyTorch GRU param init: U(-1/sqrt(H), 1/sqrt(H)); shapes per nn.GRU.
    bound = 1.0 / (H ** 0.5)
    w_ih = jax.random.uniform(k1, (3 * H, I), minval=-bound, maxval=bound, dtype=jnp.float32)
    w_hh = jax.random.uniform(k2, (3 * H, H), minval=-bound, maxval=bound, dtype=jnp.float32)
    b_ih = jax.random.uniform(k3, (3 * H,), minval=-bound, maxval=bound, dtype=jnp.float32)
    b_hh = jax.random.uniform(k4, (3 * H,), minval=-bound, maxval=bound, dtype=jnp.float32)

    # One-time parameter packing (outside the jitted per-call path).
    wih_t, whh_t, bias_gi, b_hn = pack_gru_params(w_ih, w_hh, b_ih, b_hh)
    jax.block_until_ready((wih_t, whh_t, bias_gi, b_hn))

    output, hidden = encoder_gru_forward(x, h0, wih_t, whh_t, bias_gi, b_hn)
    jax.block_until_ready((output, hidden))

    out_ref, hid_ref = gru_reference(x, h0, w_ih, w_hh, b_ih, b_hh)
    assert output.shape == (T, B, H) and hidden.shape == (1, B, H)
    assert jnp.allclose(output, out_ref, atol=1e-5, rtol=1e-5)
    assert jnp.allclose(hidden, hid_ref, atol=1e-5, rtol=1e-5)

    print("KERNEL_OK")
</pallas_src>

<mosaic_0001>
module attributes {stable_mosaic.version = 11 : i64} {
  func.func @gru_kernel(%arg0: i32, %arg1: memref<64x32xf32, #tpu.memory_space<vmem>>, %arg2: memref<1x8x32xf32, #tpu.memory_space<vmem>>, %arg3: memref<32x96xf32, #tpu.memory_space<vmem>>, %arg4: memref<32x96xf32, #tpu.memory_space<vmem>>, %arg5: memref<1x96xf32, #tpu.memory_space<vmem>>, %arg6: memref<1x32xf32, #tpu.memory_space<vmem>>, %arg7: memref<8x8x32xf32, #tpu.memory_space<vmem>>, %arg8: memref<1x8x32xf32, #tpu.memory_space<vmem>>, %arg9: memref<64x96xf32, #tpu.memory_space<vmem>>) attributes {dimension_semantics = [#tpu.dimension_semantics<arbitrary>], iteration_bounds = array<i64: 1>, scalar_prefetch = 0 : i64, scratch_operands = 1 : i64, tpu.core_type = #tpu.core_type<tc>, window_params = [{pipeline_mode = #tpu.pipeline_mode<synchronous>, transform_indices = @transform_0, window_bounds = array<i64: 64, 32>}, {pipeline_mode = #tpu.pipeline_mode<synchronous>, transform_indices = @transform_1, window_bounds = array<i64: 1, 8, 32>}, {pipeline_mode = #tpu.pipeline_mode<synchronous>, transform_indices = @transform_2, window_bounds = array<i64: 32, 96>}, {pipeline_mode = #tpu.pipeline_mode<synchronous>, transform_indices = @transform_3, window_bounds = array<i64: 32, 96>}, {pipeline_mode = #tpu.pipeline_mode<synchronous>, transform_indices = @transform_4, window_bounds = array<i64: 1, 96>}, {pipeline_mode = #tpu.pipeline_mode<synchronous>, transform_indices = @transform_5, window_bounds = array<i64: 1, 32>}, {pipeline_mode = #tpu.pipeline_mode<synchronous>, transform_indices = @transform_6, window_bounds = array<i64: 8, 8, 32>}, {pipeline_mode = #tpu.pipeline_mode<synchronous>, transform_indices = @transform_7, window_bounds = array<i64: 1, 8, 32>}]} {
    %c0 = arith.constant 0 : index
    %c0_0 = arith.constant 0 : index
    %0 = vector.load %arg1[%c0, %c0_0] : memref<64x32xf32, #tpu.memory_space<vmem>>, vector<64x32xf32>
    %c0_1 = arith.constant 0 : index
    %c0_2 = arith.constant 0 : index
    %1 = vector.load %arg3[%c0_1, %c0_2] : memref<32x96xf32, #tpu.memory_space<vmem>>, vector<32x96xf32>
    %cst = arith.constant dense<0.000000e+00> : vector<64x96xf32>
    %2 = tpu.matmul %0, %1, %cst {dimension_numbers = #tpu.dot_dimension_numbers<[1], [0], [0], [1], [0, 0, 1, 1], [], []>} : vector<64x32xf32>, vector<32x96xf32>, vector<64x96xf32> -> vector<64x96xf32>
    %c0_3 = arith.constant 0 : index
    %c0_4 = arith.constant 0 : index
    %3 = vector.load %arg5[%c0_3, %c0_4] : memref<1x96xf32, #tpu.memory_space<vmem>>, vector<1x96xf32>
    %4 = vector.broadcast %3 : vector<1x96xf32> to vector<64x96xf32>
    %5 = arith.addf %2, %4 : vector<64x96xf32>
    %c0_5 = arith.constant 0 : index
    %c0_6 = arith.constant 0 : index
    %6 = vector.load %arg9[%c0_5, %c0_6] : memref<64x96xf32, #tpu.memory_space<vmem>>, vector<64x96xf32>
    tpu.vector_store %arg9[%c0_5, %c0_6], %5 {strides = array<i32>} : memref<64x96xf32, #tpu.memory_space<vmem>>, vector<64x96xf32>,
    %c0_7 = arith.constant 0 : index
    %c0_8 = arith.constant 0 : index
    %7 = vector.load %arg4[%c0_7, %c0_8] : memref<32x96xf32, #tpu.memory_space<vmem>>, vector<32x96xf32>
    %c0_9 = arith.constant 0 : index
    %c0_10 = arith.constant 0 : index
    %8 = vector.load %arg6[%c0_9, %c0_10] : memref<1x32xf32, #tpu.memory_space<vmem>>, vector<1x32xf32>
    %9 = vector.shape_cast %8 : vector<1x32xf32> to vector<1x32xf32>
    %10 = vector.broadcast %9 : vector<1x32xf32> to vector<8x32xf32>
    %c0_11 = arith.constant 0 : index
    %c0_12 = arith.constant 0 : index
    %c0_13 = arith.constant 0 : index
    %11 = vector.load %arg2[%c0_11, %c0_12, %c0_13] : memref<1x8x32xf32, #tpu.memory_space<vmem>>, vector<1x8x32xf32>
    %12 = vector.shape_cast %11 : vector<1x8x32xf32> to vector<8x32xf32>
    %c0_i32 = arith.constant 0 : i32
    %c8_i32 = arith.constant 8 : i32
    %13 = arith.muli %c0_i32, %c8_i32 : i32
    %14 = tpu.assume_multiple %13, 8 : i32
    %15 = arith.index_cast %14 : i32 to index
    %c0_14 = arith.constant 0 : index
    %16 = vector.load %arg9[%15, %c0_14] : memref<64x96xf32, #tpu.memory_space<vmem>>, vector<8x96xf32>
    %cst_15 = arith.constant dense<0.000000e+00> : vector<8x96xf32>
    %17 = tpu.matmul %12, %7, %cst_15 {dimension_numbers = #tpu.dot_dimension_numbers<[1], [0], [0], [1], [0, 0, 1, 1], [], []>} : vector<8x32xf32>, vector<32x96xf32>, vector<8x96xf32> -> vector<8x96xf32>
    %18 = vector.extract_strided_slice %16 {offsets = [0, 0], sizes = [8, 64], strides = [1, 1]} : vector<8x96xf32> to vector<8x64xf32>
    %19 = vector.extract_strided_slice %17 {offsets = [0, 0], sizes = [8, 64], strides = [1, 1]} : vector<8x96xf32> to vector<8x64xf32>
    %20 = arith.addf %18, %19 : vector<8x64xf32>
    %21 = arith.negf %20 : vector<8x64xf32>
    %22 = math.exp %21 : vector<8x64xf32>
    %cst_16 = arith.constant 1.000000e+00 : f32
    %23 = vector.broadcast %cst_16 : f32 to vector<8x64xf32>
    %24 = arith.addf %23, %22 : vector<8x64xf32>
    %25 = arith.divf %23, %24 : vector<8x64xf32>
    %26 = vector.extract_strided_slice %25 {offsets = [0, 0], sizes = [8, 32], strides = [1, 1]} : vector<8x64xf32> to vector<8x32xf32>
    %27 = vector.extract_strided_slice %25 {offsets = [0, 32], sizes = [8, 32], strides = [1, 1]} : vector<8x64xf32> to vector<8x32xf32>
    %28 = vector.extract_strided_slice %16 {offsets = [0, 64], sizes = [8, 32], strides = [1, 1]} : vector<8x96xf32> to vector<8x32xf32>
    %29 = vector.extract_strided_slice %17 {offsets = [0, 64], sizes = [8, 32], strides = [1, 1]} : vector<8x96xf32> to vector<8x32xf32>
    %30 = arith.addf %29, %10 : vector<8x32xf32>
    %31 = arith.mulf %26, %30 : vector<8x32xf32>
    %32 = arith.addf %28, %31 : vector<8x32xf32>
    %33 = math.tanh %32 : vector<8x32xf32>
    %34 = arith.subf %12, %33 : vector<8x32xf32>
    %35 = arith.mulf %27, %34 : vector<8x32xf32>
    %36 = arith.addf %33, %35 : vector<8x32xf32>
    %37 = arith.index_cast %c0_i32 : i32 to index
    %c0_17 = arith.constant 0 : index
    %c0_18 = arith.constant 0 : index
    %38 = vector.load %arg7[%37, %c0_17, %c0_18] : memref<8x8x32xf32, #tpu.memory_space<vmem>>, vector<1x8x32xf32>
    %39 = vector.shape_cast %38 : vector<1x8x32xf32> to vector<8x32xf32>
    %40 = vector.shape_cast %36 : vector<8x32xf32> to vector<1x8x32xf32>
    tpu.vector_store %arg7[%37, %c0_17, %c0_18], %40 {strides = array<i32>} : memref<8x8x32xf32, #tpu.memory_space<vmem>>, vector<1x8x32xf32>,
    %c1_i32 = arith.constant 1 : i32
    %c8_i32_19 = arith.constant 8 : i32
    %41 = arith.muli %c1_i32, %c8_i32_19 : i32
    %42 = tpu.assume_multiple %41, 8 : i32
    %43 = arith.index_cast %42 : i32 to index
    %c0_20 = arith.constant 0 : index
    %44 = vector.load %arg9[%43, %c0_20] : memref<64x96xf32, #tpu.memory_space<vmem>>, vector<8x96xf32>
    %cst_21 = arith.constant dense<0.000000e+00> : vector<8x96xf32>
    %45 = tpu.matmul %36, %7, %cst_21 {dimension_numbers = #tpu.dot_dimension_numbers<[1], [0], [0], [1], [0, 0, 1, 1], [], []>} : vector<8x32xf32>, vector<32x96xf32>, vector<8x96xf32> -> vector<8x96xf32>
    %46 = vector.extract_strided_slice %44 {offsets = [0, 0], sizes = [8, 64], strides = [1, 1]} : vector<8x96xf32> to vector<8x64xf32>
    %47 = vector.extract_strided_slice %45 {offsets = [0, 0], sizes = [8, 64], strides = [1, 1]} : vector<8x96xf32> to vector<8x64xf32>
    %48 = arith.addf %46, %47 : vector<8x64xf32>
    %49 = arith.negf %48 : vector<8x64xf32>
    %50 = math.exp %49 : vector<8x64xf32>
    %cst_22 = arith.constant 1.000000e+00 : f32
    %51 = vector.broadcast %cst_22 : f32 to vector<8x64xf32>
    %52 = arith.addf %51, %50 : vector<8x64xf32>
    %53 = arith.divf %51, %52 : vector<8x64xf32>
    %54 = vector.extract_strided_slice %53 {offsets = [0, 0], sizes = [8, 32], strides = [1, 1]} : vector<8x64xf32> to vector<8x32xf32>
    %55 = vector.extract_strided_slice %53 {offsets = [0, 32], sizes = [8, 32], strides = [1, 1]} : vector<8x64xf32> to vector<8x32xf32>
    %56 = vector.extract_strided_slice %44 {offsets = [0, 64], sizes = [8, 32], strides = [1, 1]} : vector<8x96xf32> to vector<8x32xf32>
    %57 = vector.extract_strided_slice %45 {offsets = [0, 64], sizes = [8, 32], strides = [1, 1]} : vector<8x96xf32> to vector<8x32xf32>
    %58 = arith.addf %57, %10 : vector<8x32xf32>
    %59 = arith.mulf %54, %58 : vector<8x32xf32>
    %60 = arith.addf %56, %59 : vector<8x32xf32>
    %61 = math.tanh %60 : vector<8x32xf32>
    %62 = arith.subf %36, %61 : vector<8x32xf32>
    %63 = arith.mulf %55, %62 : vector<8x32xf32>
    %64 = arith.addf %61, %63 : vector<8x32xf32>
    %65 = arith.index_cast %c1_i32 : i32 to index
    %c0_23 = arith.constant 0 : index
    %c0_24 = arith.constant 0 : index
    %66 = vector.load %arg7[%65, %c0_23, %c0_24] : memref<8x8x32xf32, #tpu.memory_space<vmem>>, vector<1x8x32xf32>
    %67 = vector.shape_cast %66 : vector<1x8x32xf32> to vector<8x32xf32>
    %68 = vector.shape_cast %64 : vector<8x32xf32> to vector<1x8x32xf32>
    tpu.vector_store %arg7[%65, %c0_23, %c0_24], %68 {strides = array<i32>} : memref<8x8x32xf32, #tpu.memory_space<vmem>>, vector<1x8x32xf32>,
    %c2_i32 = arith.constant 2 : i32
    %c8_i32_25 = arith.constant 8 : i32
    %69 = arith.muli %c2_i32, %c8_i32_25 : i32
    %70 = tpu.assume_multiple %69, 8 : i32
    %71 = arith.index_cast %70 : i32 to index
    %c0_26 = arith.constant 0 : index
    %72 = vector.load %arg9[%71, %c0_26] : memref<64x96xf32, #tpu.memory_space<vmem>>, vector<8x96xf32>
    %cst_27 = arith.constant dense<0.000000e+00> : vector<8x96xf32>
    %73 = tpu.matmul %64, %7, %cst_27 {dimension_numbers = #tpu.dot_dimension_numbers<[1], [0], [0], [1], [0, 0, 1, 1], [], []>} : vector<8x32xf32>, vector<32x96xf32>, vector<8x96xf32> -> vector<8x96xf32>
    %74 = vector.extract_strided_slice %72 {offsets = [0, 0], sizes = [8, 64], strides = [1, 1]} : vector<8x96xf32> to vector<8x64xf32>
    %75 = vector.extract_strided_slice %73 {offsets = [0, 0], sizes = [8, 64], strides = [1, 1]} : vector<8x96xf32> to vector<8x64xf32>
    %76 = arith.addf %74, %75 : vector<8x64xf32>
    %77 = arith.negf %76 : vector<8x64xf32>
    %78 = math.exp %77 : vector<8x64xf32>
    %cst_28 = arith.constant 1.000000e+00 : f32
    %79 = vector.broadcast %cst_28 : f32 to vector<8x64xf32>
    %80 = arith.addf %79, %78 : vector<8x64xf32>
    %81 = arith.divf %79, %80 : vector<8x64xf32>
    %82 = vector.extract_strided_slice %81 {offsets = [0, 0], sizes = [8, 32], strides = [1, 1]} : vector<8x64xf32> to vector<8x32xf32>
    %83 = vector.extract_strided_slice %81 {offsets = [0, 32], sizes = [8, 32], strides = [1, 1]} : vector<8x64xf32> to vector<8x32xf32>
    %84 = vector.extract_strided_slice %72 {offsets = [0, 64], sizes = [8, 32], strides = [1, 1]} : vector<8x96xf32> to vector<8x32xf32>
    %85 = vector.extract_strided_slice %73 {offsets = [0, 64], sizes = [8, 32], strides = [1, 1]} : vector<8x96xf32> to vector<8x32xf32>
    %86 = arith.addf %85, %10 : vector<8x32xf32>
    %87 = arith.mulf %82, %86 : vector<8x32xf32>
    %88 = arith.addf %84, %87 : vector<8x32xf32>
    %89 = math.tanh %88 : vector<8x32xf32>
    %90 = arith.subf %64, %89 : vector<8x32xf32>
    %91 = arith.mulf %83, %90 : vector<8x32xf32>
    %92 = arith.addf %89, %91 : vector<8x32xf32>
    %93 = arith.index_cast %c2_i32 : i32 to index
    %c0_29 = arith.constant 0 : index
    %c0_30 = arith.constant 0 : index
    %94 = vector.load %arg7[%93, %c0_29, %c0_30] : memref<8x8x32xf32, #tpu.memory_space<vmem>>, vector<1x8x32xf32>
    %95 = vector.shape_cast %94 : vector<1x8x32xf32> to vector<8x32xf32>
    %96 = vector.shape_cast %92 : vector<8x32xf32> to vector<1x8x32xf32>
    tpu.vector_store %arg7[%93, %c0_29, %c0_30], %96 {strides = array<i32>} : memref<8x8x32xf32, #tpu.memory_space<vmem>>, vector<1x8x32xf32>,
    %c3_i32 = arith.constant 3 : i32
    %c8_i32_31 = arith.constant 8 : i32
    %97 = arith.muli %c3_i32, %c8_i32_31 : i32
    %98 = tpu.assume_multiple %97, 8 : i32
    %99 = arith.index_cast %98 : i32 to index
    %c0_32 = arith.constant 0 : index
    %100 = vector.load %arg9[%99, %c0_32] : memref<64x96xf32, #tpu.memory_space<vmem>>, vector<8x96xf32>
    %cst_33 = arith.constant dense<0.000000e+00> : vector<8x96xf32>
    %101 = tpu.matmul %92, %7, %cst_33 {dimension_numbers = #tpu.dot_dimension_numbers<[1], [0], [0], [1], [0, 0, 1, 1], [], []>} : vector<8x32xf32>, vector<32x96xf32>, vector<8x96xf32> -> vector<8x96xf32>
    %102 = vector.extract_strided_slice %100 {offsets = [0, 0], sizes = [8, 64], strides = [1, 1]} : vector<8x96xf32> to vector<8x64xf32>
    %103 = vector.extract_strided_slice %101 {offsets = [0, 0], sizes = [8, 64], strides = [1, 1]} : vector<8x96xf32> to vector<8x64xf32>
    %104 = arith.addf %102, %103 : vector<8x64xf32>
    %105 = arith.negf %104 : vector<8x64xf32>
    %106 = math.exp %105 : vector<8x64xf32>
    %cst_34 = arith.constant 1.000000e+00 : f32
    %107 = vector.broadcast %cst_34 : f32 to vector<8x64xf32>
    %108 = arith.addf %107, %106 : vector<8x64xf32>
    %109 = arith.divf %107, %108 : vector<8x64xf32>
    %110 = vector.extract_strided_slice %109 {offsets = [0, 0], sizes = [8, 32], strides = [1, 1]} : vector<8x64xf32> to vector<8x32xf32>
    %111 = vector.extract_strided_slice %109 {offsets = [0, 32], sizes = [8, 32], strides = [1, 1]} : vector<8x64xf32> to vector<8x32xf32>
    %112 = vector.extract_strided_slice %100 {offsets = [0, 64], sizes = [8, 32], strides = [1, 1]} : vector<8x96xf32> to vector<8x32xf32>
    %113 = vector.extract_strided_slice %101 {offsets = [0, 64], sizes = [8, 32], strides = [1, 1]} : vector<8x96xf32> to vector<8x32xf32>
    %114 = arith.addf %113, %10 : vector<8x32xf32>
    %115 = arith.mulf %110, %114 : vector<8x32xf32>
    %116 = arith.addf %112, %115 : vector<8x32xf32>
    %117 = math.tanh %116 : vector<8x32xf32>
    %118 = arith.subf %92, %117 : vector<8x32xf32>
    %119 = arith.mulf %111, %118 : vector<8x32xf32>
    %120 = arith.addf %117, %119 : vector<8x32xf32>
    %121 = arith.index_cast %c3_i32 : i32 to index
    %c0_35 = arith.constant 0 : index
    %c0_36 = arith.constant 0 : index
    %122 = vector.load %arg7[%121, %c0_35, %c0_36] : memref<8x8x32xf32, #tpu.memory_space<vmem>>, vector<1x8x32xf32>
    %123 = vector.shape_cast %122 : vector<1x8x32xf32> to vector<8x32xf32>
    %124 = vector.shape_cast %120 : vector<8x32xf32> to vector<1x8x32xf32>
    tpu.vector_store %arg7[%121, %c0_35, %c0_36], %124 {strides = array<i32>} : memref<8x8x32xf32, #tpu.memory_space<vmem>>, vector<1x8x32xf32>,
    %c4_i32 = arith.constant 4 : i32
    %c8_i32_37 = arith.constant 8 : i32
    %125 = arith.muli %c4_i32, %c8_i32_37 : i32
    %126 = tpu.assume_multiple %125, 8 : i32
    %127 = arith.index_cast %126 : i32 to index
    %c0_38 = arith.constant 0 : index
    %128 = vector.load %arg9[%127, %c0_38] : memref<64x96xf32, #tpu.memory_space<vmem>>, vector<8x96xf32>
    %cst_39 = arith.constant dense<0.000000e+00> : vector<8x96xf32>
    %129 = tpu.matmul %120, %7, %cst_39 {dimension_numbers = #tpu.dot_dimension_numbers<[1], [0], [0], [1], [0, 0, 1, 1], [], []>} : vector<8x32xf32>, vector<32x96xf32>, vector<8x96xf32> -> vector<8x96xf32>
    %130 = vector.extract_strided_slice %128 {offsets = [0, 0], sizes = [8, 64], strides = [1, 1]} : vector<8x96xf32> to vector<8x64xf32>
    %131 = vector.extract_strided_slice %129 {offsets = [0, 0], sizes = [8, 64], strides = [1, 1]} : vector<8x96xf32> to vector<8x64xf32>
    %132 = arith.addf %130, %131 : vector<8x64xf32>
    %133 = arith.negf %132 : vector<8x64xf32>
    %134 = math.exp %133 : vector<8x64xf32>
    %cst_40 = arith.constant 1.000000e+00 : f32
    %135 = vector.broadcast %cst_40 : f32 to vector<8x64xf32>
    %136 = arith.addf %135, %134 : vector<8x64xf32>
    %137 = arith.divf %135, %136 : vector<8x64xf32>
    %138 = vector.extract_strided_slice %137 {offsets = [0, 0], sizes = [8, 32], strides = [1, 1]} : vector<8x64xf32> to vector<8x32xf32>
    %139 = vector.extract_strided_slice %137 {offsets = [0, 32], sizes = [8, 32], strides = [1, 1]} : vector<8x64xf32> to vector<8x32xf32>
    %140 = vector.extract_strided_slice %128 {offsets = [0, 64], sizes = [8, 32], strides = [1, 1]} : vector<8x96xf32> to vector<8x32xf32>
    %141 = vector.extract_strided_slice %129 {offsets = [0, 64], sizes = [8, 32], strides = [1, 1]} : vector<8x96xf32> to vector<8x32xf32>
    %142 = arith.addf %141, %10 : vector<8x32xf32>
    %143 = arith.mulf %138, %142 : vector<8x32xf32>
    %144 = arith.addf %140, %143 : vector<8x32xf32>
    %145 = math.tanh %144 : vector<8x32xf32>
    %146 = arith.subf %120, %145 : vector<8x32xf32>
    %147 = arith.mulf %139, %146 : vector<8x32xf32>
    %148 = arith.addf %145, %147 : vector<8x32xf32>
    %149 = arith.index_cast %c4_i32 : i32 to index
    %c0_41 = arith.constant 0 : index
    %c0_42 = arith.constant 0 : index
    %150 = vector.load %arg7[%149, %c0_41, %c0_42] : memref<8x8x32xf32, #tpu.memory_space<vmem>>, vector<1x8x32xf32>
    %151 = vector.shape_cast %150 : vector<1x8x32xf32> to vector<8x32xf32>
    %152 = vector.shape_cast %148 : vector<8x32xf32> to vector<1x8x32xf32>
    tpu.vector_store %arg7[%149, %c0_41, %c0_42], %152 {strides = array<i32>} : memref<8x8x32xf32, #tpu.memory_space<vmem>>, vector<1x8x32xf32>,
    %c5_i32 = arith.constant 5 : i32
    %c8_i32_43 = arith.constant 8 : i32
    %153 = arith.muli %c5_i32, %c8_i32_43 : i32
    %154 = tpu.assume_multiple %153, 8 : i32
    %155 = arith.index_cast %154 : i32 to index
    %c0_44 = arith.constant 0 : index
    %156 = vector.load %arg9[%155, %c0_44] : memref<64x96xf32, #tpu.memory_space<vmem>>, vector<8x96xf32>
    %cst_45 = arith.constant dense<0.000000e+00> : vector<8x96xf32>
    %157 = tpu.matmul %148, %7, %cst_45 {dimension_numbers = #tpu.dot_dimension_numbers<[1], [0], [0], [1], [0, 0, 1, 1], [], []>} : vector<8x32xf32>, vector<32x96xf32>, vector<8x96xf32> -> vector<8x96xf32>
    %158 = vector.extract_strided_slice %156 {offsets = [0, 0], sizes = [8, 64], strides = [1, 1]} : vector<8x96xf32> to vector<8x64xf32>
    %159 = vector.extract_strided_slice %157 {offsets = [0, 0], sizes = [8, 64], strides = [1, 1]} : vector<8x96xf32> to vector<8x64xf32>
    %160 = arith.addf %158, %159 : vector<8x64xf32>
    %161 = arith.negf %160 : vector<8x64xf32>
    %162 = math.exp %161 : vector<8x64xf32>
    %cst_46 = arith.constant 1.000000e+00 : f32
    %163 = vector.broadcast %cst_46 : f32 to vector<8x64xf32>
    %164 = arith.addf %163, %162 : vector<8x64xf32>
    %165 = arith.divf %163, %164 : vector<8x64xf32>
    %166 = vector.extract_strided_slice %165 {offsets = [0, 0], sizes = [8, 32], strides = [1, 1]} : vector<8x64xf32> to vector<8x32xf32>
    %167 = vector.extract_strided_slice %165 {offsets = [0, 32], sizes = [8, 32], strides = [1, 1]} : vector<8x64xf32> to vector<8x32xf32>
    %168 = vector.extract_strided_slice %156 {offsets = [0, 64], sizes = [8, 32], strides = [1, 1]} : vector<8x96xf32> to vector<8x32xf32>
    %169 = vector.extract_strided_slice %157 {offsets = [0, 64], sizes = [8, 32], strides = [1, 1]} : vector<8x96xf32> to vector<8x32xf32>
    %170 = arith.addf %169, %10 : vector<8x32xf32>
    %171 = arith.mulf %166, %170 : vector<8x32xf32>
    %172 = arith.addf %168, %171 : vector<8x32xf32>
    %173 = math.tanh %172 : vector<8x32xf32>
    %174 = arith.subf %148, %173 : vector<8x32xf32>
    %175 = arith.mulf %167, %174 : vector<8x32xf32>
    %176 = arith.addf %173, %175 : vector<8x32xf32>
    %177 = arith.index_cast %c5_i32 : i32 to index
    %c0_47 = arith.constant 0 : index
    %c0_48 = arith.constant 0 : index
    %178 = vector.load %arg7[%177, %c0_47, %c0_48] : memref<8x8x32xf32, #tpu.memory_space<vmem>>, vector<1x8x32xf32>
    %179 = vector.shape_cast %178 : vector<1x8x32xf32> to vector<8x32xf32>
    %180 = vector.shape_cast %176 : vector<8x32xf32> to vector<1x8x32xf32>
    tpu.vector_store %arg7[%177, %c0_47, %c0_48], %180 {strides = array<i32>} : memref<8x8x32xf32, #tpu.memory_space<vmem>>, vector<1x8x32xf32>,
    %c6_i32 = arith.constant 6 : i32
    %c8_i32_49 = arith.constant 8 : i32
    %181 = arith.muli %c6_i32, %c8_i32_49 : i32
    %182 = tpu.assume_multiple %181, 8 : i32
    %183 = arith.index_cast %182 : i32 to index
    %c0_50 = arith.constant 0 : index
    %184 = vector.load %arg9[%183, %c0_50] : memref<64x96xf32, #tpu.memory_space<vmem>>, vector<8x96xf32>
    %cst_51 = arith.constant dense<0.000000e+00> : vector<8x96xf32>
    %185 = tpu.matmul %176, %7, %cst_51 {dimension_numbers = #tpu.dot_dimension_numbers<[1], [0], [0], [1], [0, 0, 1, 1], [], []>} : vector<8x32xf32>, vector<32x96xf32>, vector<8x96xf32> -> vector<8x96xf32>
    %186 = vector.extract_strided_slice %184 {offsets = [0, 0], sizes = [8, 64], strides = [1, 1]} : vector<8x96xf32> to vector<8x64xf32>
    %187 = vector.extract_strided_slice %185 {offsets = [0, 0], sizes = [8, 64], strides = [1, 1]} : vector<8x96xf32> to vector<8x64xf32>
    %188 = arith.addf %186, %187 : vector<8x64xf32>
    %189 = arith.negf %188 : vector<8x64xf32>
    %190 = math.exp %189 : vector<8x64xf32>
    %cst_52 = arith.constant 1.000000e+00 : f32
    %191 = vector.broadcast %cst_52 : f32 to vector<8x64xf32>
    %192 = arith.addf %191, %190 : vector<8x64xf32>
    %193 = arith.divf %191, %192 : vector<8x64xf32>
    %194 = vector.extract_strided_slice %193 {offsets = [0, 0], sizes = [8, 32], strides = [1, 1]} : vector<8x64xf32> to vector<8x32xf32>
    %195 = vector.extract_strided_slice %193 {offsets = [0, 32], sizes = [8, 32], strides = [1, 1]} : vector<8x64xf32> to vector<8x32xf32>
    %196 = vector.extract_strided_slice %184 {offsets = [0, 64], sizes = [8, 32], strides = [1, 1]} : vector<8x96xf32> to vector<8x32xf32>
    %197 = vector.extract_strided_slice %185 {offsets = [0, 64], sizes = [8, 32], strides = [1, 1]} : vector<8x96xf32> to vector<8x32xf32>
    %198 = arith.addf %197, %10 : vector<8x32xf32>
    %199 = arith.mulf %194, %198 : vector<8x32xf32>
    %200 = arith.addf %196, %199 : vector<8x32xf32>
    %201 = math.tanh %200 : vector<8x32xf32>
    %202 = arith.subf %176, %201 : vector<8x32xf32>
    %203 = arith.mulf %195, %202 : vector<8x32xf32>
    %204 = arith.addf %201, %203 : vector<8x32xf32>
    %205 = arith.index_cast %c6_i32 : i32 to index
    %c0_53 = arith.constant 0 : index
    %c0_54 = arith.constant 0 : index
    %206 = vector.load %arg7[%205, %c0_53, %c0_54] : memref<8x8x32xf32, #tpu.memory_space<vmem>>, vector<1x8x32xf32>
    %207 = vector.shape_cast %206 : vector<1x8x32xf32> to vector<8x32xf32>
    %208 = vector.shape_cast %204 : vector<8x32xf32> to vector<1x8x32xf32>
    tpu.vector_store %arg7[%205, %c0_53, %c0_54], %208 {strides = array<i32>} : memref<8x8x32xf32, #tpu.memory_space<vmem>>, vector<1x8x32xf32>,
    %c7_i32 = arith.constant 7 : i32
    %c8_i32_55 = arith.constant 8 : i32
    %209 = arith.muli %c7_i32, %c8_i32_55 : i32
    %210 = tpu.assume_multiple %209, 8 : i32
    %211 = arith.index_cast %210 : i32 to index
    %c0_56 = arith.constant 0 : index
    %212 = vector.load %arg9[%211, %c0_56] : memref<64x96xf32, #tpu.memory_space<vmem>>, vector<8x96xf32>
    %cst_57 = arith.constant dense<0.000000e+00> : vector<8x96xf32>
    %213 = tpu.matmul %204, %7, %cst_57 {dimension_numbers = #tpu.dot_dimension_numbers<[1], [0], [0], [1], [0, 0, 1, 1], [], []>} : vector<8x32xf32>, vector<32x96xf32>, vector<8x96xf32> -> vector<8x96xf32>
    %214 = vector.extract_strided_slice %212 {offsets = [0, 0], sizes = [8, 64], strides = [1, 1]} : vector<8x96xf32> to vector<8x64xf32>
    %215 = vector.extract_strided_slice %213 {offsets = [0, 0], sizes = [8, 64], strides = [1, 1]} : vector<8x96xf32> to vector<8x64xf32>
    %216 = arith.addf %214, %215 : vector<8x64xf32>
    %217 = arith.negf %216 : vector<8x64xf32>
    %218 = math.exp %217 : vector<8x64xf32>
    %cst_58 = arith.constant 1.000000e+00 : f32
    %219 = vector.broadcast %cst_58 : f32 to vector<8x64xf32>
    %220 = arith.addf %219, %218 : vector<8x64xf32>
    %221 = arith.divf %219, %220 : vector<8x64xf32>
    %222 = vector.extract_strided_slice %221 {offsets = [0, 0], sizes = [8, 32], strides = [1, 1]} : vector<8x64xf32> to vector<8x32xf32>
    %223 = vector.extract_strided_slice %221 {offsets = [0, 32], sizes = [8, 32], strides = [1, 1]} : vector<8x64xf32> to vector<8x32xf32>
    %224 = vector.extract_strided_slice %212 {offsets = [0, 64], sizes = [8, 32], strides = [1, 1]} : vector<8x96xf32> to vector<8x32xf32>
    %225 = vector.extract_strided_slice %213 {offsets = [0, 64], sizes = [8, 32], strides = [1, 1]} : vector<8x96xf32> to vector<8x32xf32>
    %226 = arith.addf %225, %10 : vector<8x32xf32>
    %227 = arith.mulf %222, %226 : vector<8x32xf32>
    %228 = arith.addf %224, %227 : vector<8x32xf32>
    %229 = math.tanh %228 : vector<8x32xf32>
    %230 = arith.subf %204, %229 : vector<8x32xf32>
    %231 = arith.mulf %223, %230 : vector<8x32xf32>
    %232 = arith.addf %229, %231 : vector<8x32xf32>
    %233 = arith.index_cast %c7_i32 : i32 to index
    %c0_59 = arith.constant 0 : index
    %c0_60 = arith.constant 0 : index
    %234 = vector.load %arg7[%233, %c0_59, %c0_60] : memref<8x8x32xf32, #tpu.memory_space<vmem>>, vector<1x8x32xf32>
    %235 = vector.shape_cast %234 : vector<1x8x32xf32> to vector<8x32xf32>
    %236 = vector.shape_cast %232 : vector<8x32xf32> to vector<1x8x32xf32>
    tpu.vector_store %arg7[%233, %c0_59, %c0_60], %236 {strides = array<i32>} : memref<8x8x32xf32, #tpu.memory_space<vmem>>, vector<1x8x32xf32>,
    %c8_i32_61 = arith.constant 8 : i32
    %c0_62 = arith.constant 0 : index
    %c0_63 = arith.constant 0 : index
    %c0_64 = arith.constant 0 : index
    %237 = vector.load %arg8[%c0_62, %c0_63, %c0_64] : memref<1x8x32xf32, #tpu.memory_space<vmem>>, vector<1x8x32xf32>
    %238 = vector.shape_cast %237 : vector<1x8x32xf32> to vector<8x32xf32>
    %239 = vector.shape_cast %232 : vector<8x32xf32> to vector<1x8x32xf32>
    tpu.vector_store %arg8[%c0_62, %c0_63, %c0_64], %239 {strides = array<i32>} : memref<1x8x32xf32, #tpu.memory_space<vmem>>, vector<1x8x32xf32>,
    return
  }
  func.func @transform_0(%arg0: i32) -> (i32, i32) {
    %c0_i32 = arith.constant 0 : i32
    %c0_i32_0 = arith.constant 0 : i32
    %c0_i32_1 = arith.constant 0 : i32
    return %c0_i32, %c0_i32_0 : i32, i32
  }
  func.func @transform_1(%arg0: i32) -> (i32, i32, i32) {
    %c0_i32 = arith.constant 0 : i32
    %c0_i32_0 = arith.constant 0 : i32
    %c0_i32_1 = arith.constant 0 : i32
    %c0_i32_2 = arith.constant 0 : i32
    return %c0_i32, %c0_i32_0, %c0_i32_1 : i32, i32, i32
  }
  func.func @transform_2(%arg0: i32) -> (i32, i32) {
    %c0_i32 = arith.constant 0 : i32
    %c0_i32_0 = arith.constant 0 : i32
    %c0_i32_1 = arith.constant 0 : i32
    return %c0_i32, %c0_i32_0 : i32, i32
  }
  func.func @transform_3(%arg0: i32) -> (i32, i32) {
    %c0_i32 = arith.constant 0 : i32
    %c0_i32_0 = arith.constant 0 : i32
    %c0_i32_1 = arith.constant 0 : i32
    return %c0_i32, %c0_i32_0 : i32, i32
  }
  func.func @transform_4(%arg0: i32) -> (i32, i32) {
    %c0_i32 = arith.constant 0 : i32
    %c0_i32_0 = arith.constant 0 : i32
    %c0_i32_1 = arith.constant 0 : i32
    return %c0_i32, %c0_i32_0 : i32, i32
  }
  func.func @transform_5(%arg0: i32) -> (i32, i32) {
    %c0_i32 = arith.constant 0 : i32
    %c0_i32_0 = arith.constant 0 : i32
    %c0_i32_1 = arith.constant 0 : i32
    return %c0_i32, %c0_i32_0 : i32, i32
  }
  func.func @transform_6(%arg0: i32) -> (i32, i32, i32) {
    %c0_i32 = arith.constant 0 : i32
    %c0_i32_0 = arith.constant 0 : i32
    %c0_i32_1 = arith.constant 0 : i32
    %c0_i32_2 = arith.constant 0 : i32
    return %c0_i32, %c0_i32_0, %c0_i32_1 : i32, i32, i32
  }
  func.func @transform_7(%arg0: i32) -> (i32, i32, i32) {
    %c0_i32 = arith.constant 0 : i32
    %c0_i32_0 = arith.constant 0 : i32
    %c0_i32_1 = arith.constant 0 : i32
    %c0_i32_2 = arith.constant 0 : i32
    return %c0_i32, %c0_i32_0, %c0_i32_1 : i32, i32, i32
  }
}

</mosaic_0001>

<bundles_post_ra>
// kernel: encoder_gru_forward.1
= control target key start
LH: loop header
LB: loop body
LE: loop exit
PB: predicated region body
PF: predicated region fallthrough
CT: control target
= control target key end

     0   :  { %13 = vsyncpa [#allocation4], 0  ;;  %s1920_s0 = inlined_call_operand.hbm [shape: f32[64,32], index: 0, kind: input, shape index: {}]   ;;  %s1921_s1 = inlined_call_operand.hbm [shape: f32[1,8,32], index: 1, kind: input, shape index: {}]   ;;  %s1922_s2 = inlined_call_operand.hbm [shape: f32[32,96], index: 2, kind: input, shape index: {}]   ;;  %s1923_s3 = inlined_call_operand.hbm [shape: f32[32,96], index: 3, kind: input, shape index: {}]   ;;  %s1924_s4 = inlined_call_operand.vmem [shape: f32[1,96], index: 4, kind: input, shape index: {}]   ;;  %s1925_s5 = inlined_call_operand.vmem [shape: f32[1,32], index: 5, kind: input, shape index: {}]   ;;  %s1926_s6 = inlined_call_operand.hbm [shape: f32[8,8,32], index: 6, kind: output, shape index: {0}]   ;;  %s1927_s7 = inlined_call_operand.hbm [shape: f32[1,8,32], index: 7, kind: output, shape index: {1}]  }
   0x1   :  { %14 = vsyncpa [#allocation7], 0 }
   0x2   :  { %15 = vsyncpa [#allocation10], 0 }
   0x3   :  { %16 = vsyncpa [#allocation5], 0 }
   0x4   :  { %17 = vsyncpa [#allocation13], 0  ;;  %s1615_s24 = smov [#allocation6]   ;;  %s1616_s26 = smov [#allocation3]  }
   0x5   :  { %s36_s25 = sshll.u32 %s1615_s24, 4  ;;  %s23_s27 = sshll.u32 %s1616_s26, 4  ;;  %s37_s25 = int_to_ptr.vmem [resolvable:$true] %s36_s25  ;;  %s1669_s27 = int_to_ptr.vmem [resolvable:$true] %s23_s27 }
   0x6   :  { %s1473_s30 = scalar_lea.hbm %s1921_s1, 128 }
   0x7   :  { %p1474_p0 = scmp.ne.s32.totalorder %s1921_s1, %s1473_s30  ;;  %p1477_p1 = scmp.lt.u32.totalorder %s1473_s30, %s1921_s1 }
   0x9   :  { %p1479_p2 = pnand %p1477_p1, %p1474_p0 }
   0xb   :  { %1482 = shalt.err (!%p1479_p2)
}
   0xc   :  { %s1483_s12 = scalar_lea.vmem %s37_s25, 128  ;;  %p1488_p4 = scmp.lt.s32.totalorder %s37_s25, %s37_s25 }
   0xd   :  { %p1484_p3 = scmp.ne.s32.totalorder %s37_s25, %s1483_s12  ;;  %p1489_p5 = scmp.lt.s32.totalorder %s1483_s12, %s1483_s12 }
   0xf   :  { %p1490_p6 = por %p1489_p5, %p1488_p4 }
  0x11   :  { %p1491_p7 = pnand %p1490_p6, %p1484_p3 }
  0x13   :  { %1494 = shalt.err (!%p1491_p7)
}
  0x14   :  { %39 = dma.hbm_to_vmem [thread:$0]  %s1921_s1, 128, %s37_s25, [#allocation7]  }
  0x15   :  { %s1495_s17 = scalar_lea.hbm %s1920_s0, 1024 }
  0x16   :  { %p1496_p8 = scmp.ne.s32.totalorder %s1920_s0, %s1495_s17  ;;  %p1499_p9 = scmp.lt.u32.totalorder %s1495_s17, %s1920_s0 }
  0x18   :  { %p1501_p10 = pnand %p1499_p9, %p1496_p8 }
  0x1a   :  { %1504 = shalt.err (!%p1501_p10)
}
  0x1b   :  { %s1505_s22 = scalar_lea.vmem %s1669_s27, 1024  ;;  %p1510_p12 = scmp.lt.s32.totalorder %s1669_s27, %s1669_s27 }
  0x1c   :  { %p1506_p11 = scmp.ne.s32.totalorder %s1669_s27, %s1505_s22  ;;  %p1511_p13 = scmp.lt.s32.totalorder %s1505_s22, %s1505_s22 }
  0x1e   :  { %p1512_p0 = por %p1511_p13, %p1510_p12 }
  0x20   :  { %p1513_p1 = pnand %p1512_p0, %p1506_p11 }
  0x22   :  { %1516 = shalt.err (!%p1513_p1)
}
  0x23   :  { %s1617_s1 = smov 128   ;;  %s1618_s23 = smov 8  }
  0x24   :  { %29 = dma.hbm_to_vmem [thread:$0]  %s1920_s0, 1024, %s1669_s27, [#allocation4], %s1617_s1, %s1617_s1, %s1618_s23  }
  0x25   :  { %s1619_s26 = smov [#allocation8]   ;;  %s1620_s29 = smov [#allocation9]  }
  0x26   :  { %s45_s28 = sshll.u32 %s1619_s26, 4  ;;  %s57_s30 = sshll.u32 %s1620_s29, 4  ;;  %s46_s28 = int_to_ptr.vmem [resolvable:$true] %s45_s28  ;;  %s1703_s30 = int_to_ptr.vmem [resolvable:$true] %s57_s30 }
  0x27   :  { %s1517_s10 = scalar_lea.hbm %s1922_s2, 512 }
  0x28   :  { %p1518_p2 = scmp.ne.s32.totalorder %s1922_s2, %s1517_s10  ;;  %p1521_p3 = scmp.lt.u32.totalorder %s1517_s10, %s1922_s2 }
  0x2a   :  { %p1523_p4 = pnand %p1521_p3, %p1518_p2 }
  0x2c   :  { %1526 = shalt.err (!%p1523_p4)
}
  0x2d   :  { %s1527_s0 = scalar_lea.vmem %s46_s28, 512  ;;  %p1532_p6 = scmp.lt.s32.totalorder %s46_s28, %s46_s28 }
  0x2e   :  { %p1528_p5 = scmp.ne.s32.totalorder %s46_s28, %s1527_s0  ;;  %p1533_p7 = scmp.lt.s32.totalorder %s1527_s0, %s1527_s0 }
  0x30   :  { %p1534_p8 = por %p1533_p7, %p1532_p6 }
  0x32   :  { %p1535_p9 = pnand %p1534_p8, %p1528_p5 }
  0x34   :  { %1538 = shalt.err (!%p1535_p9)
}
  0x35   :  { %51 = dma.hbm_to_vmem [thread:$0]  %s1922_s2, 512, %s46_s28, [#allocation7], %s1617_s1, %s1617_s1, %s1618_s23  }
  0x36   :  { %s1539_s18 = scalar_lea.hbm %s1923_s3, 512 }
  0x37   :  { %p1540_p10 = scmp.ne.s32.totalorder %s1923_s3, %s1539_s18  ;;  %p1543_p11 = scmp.lt.u32.totalorder %s1539_s18, %s1923_s3 }
  0x39   :  { %p1545_p12 = pnand %p1543_p11, %p1540_p10 }
  0x3b   :  { %1548 = shalt.err (!%p1545_p12)
}
  0x3c   :  { %s1549_s24 = scalar_lea.vmem %s1703_s30, 512  ;;  %p1554_p0 = scmp.lt.s32.totalorder %s1703_s30, %s1703_s30 }
  0x3d   :  { %p1550_p13 = scmp.ne.s32.totalorder %s1703_s30, %s1549_s24  ;;  %p1555_p1 = scmp.lt.s32.totalorder %s1549_s24, %s1549_s24 }
  0x3f   :  { %p1556_p2 = por %p1555_p1, %p1554_p0 }
  0x41   :  { %p1557_p3 = pnand %p1556_p2, %p1550_p13 }
  0x43   :  { %1560 = shalt.err (!%p1557_p3)
}
  0x44   :  { %63 = dma.hbm_to_vmem [thread:$0]  %s1923_s3, 512, %s1703_s30, [#allocation10], %s1617_s1, %s1617_s1, %s1618_s23  }
  0x45   :  { %1605 = dma.done.wait [#allocation4], 1024  }
  0x46   :  { %1606 = vsyncadd [#allocation4], 4294966272 }
  0x47   :  { %1607 = dma.done.wait [#allocation7], 640  }
  0x48   :  { %1608 = vsyncadd [#allocation7], 4294966656 }
  0x49   :  { %1609 = dma.done.wait [#allocation10], 512  }
  0x4a   :  { %1610 = vsyncadd [#allocation10], 4294966784  ;;  %v1621_v0 = vmov 0.0|0.0   ;;  %vm1622_vm0 = vmmov 0   ;;  %v1623_v1 = vmov 0.0   ;;  %v88_v2 = vld [vmem:[#allocation8] sm:$0xff] }
  0x4b   :  { %1363 = vmatprep.subr.bf16.mxu1 %v1621_v0  ;;  %1275 = vmatprep.mubr.msk.f32.mxu1 %vm1622_vm0, %v1623_v1  ;;  %v89_v3 = vld [vmem:[#allocation8 + $0x8] sm:$0xff]  ;;  %v238_v4 = vld [vmem:[#allocation9] sm:$0xff]  ;;  %vm99_vm1 = vcmask 261120   ;;  %v90_v7 = vld [vmem:[#allocation8 + $0x10] sm:$0xff]  ;;  %s1624_s28 = smov 64   ;;  %vm229_vm2 = vcmask 785408  }
  0x4c   :  { %v1355_v5 = vpack.c.bf16 %v89_v3, %v88_v2  ;;  %v239_v6 = vld [vmem:[#allocation9 + $0x8] sm:$0xff]  ;;  %v91_v8 = vld [vmem:[#allocation8 + $0x18] sm:$0xff]  ;;  %v240_v11 = vld [vmem:[#allocation9 + $0x10] sm:$0xff]  ;;  %s1626_s30 = smov 96   ;;  %s1627_s8 = smov [#allocation11]  }
  0x4d   :  { %v1743_v9 = vpack.c.bf16 %v239_v6, %v238_v4  ;;  %v1359_v10 = vpack.c.bf16 %v91_v8, %v90_v7  ;;  %v241_v12 = vld [vmem:[#allocation9 + $0x18] sm:$0xff]  ;;  %v81_v17 = vld [vmem:[#allocation3 + $0x8] sm:$0xff]  ;;  %v82_v60 = vld [vmem:[#allocation3 + $0x10] sm:$0xff]  ;;  %s1141_s9 = sshll.u32 %s1627_s8, 4  ;;  %s1628_s10 = smov [#allocation12]   ;;  %s1142_s9 = int_to_ptr.vmem [resolvable:$true] %s1141_s9 }
  0x4e   :  { %v80_v13 = vld [vmem:[#allocation3] sm:$0xff]  ;;  %1356 = vmatprep.subr.bf16.mxu0 %v1355_v5  ;;  %v1750_v15 = vpack.c.bf16 %v241_v12, %v240_v11  ;;  %v83_v61 = vld [vmem:[#allocation3 + $0x18] sm:$0xff]  ;;  %v85_v63 = vld [vmem:[#allocation3 + $0x28] sm:$0xff]  ;;  %s1154_s11 = sshll.u32 %s1628_s10, 4  ;;  %s1561_s12 = scalar_lea.vmem %s1142_s9, 1024  ;;  %s1155_s11 = int_to_ptr.vmem [resolvable:$true] %s1154_s11 }
  0x4f   :  { %1255 = vmatprep.mubr.msk.f32.mxu0 %vm99_vm1, %v80_v13  ;;  %v1178_v14 = vld [vmem:[%s1925_s5] ss:$0 sm:$0xff]  ;;  %1365 = vmatpush3.bf16.msra.mxu1 %v1743_v9  ;;  %v86_v2 = vld [vmem:[#allocation3 + $0x30] sm:$0xff]  ;;  %v87_v3 = vld [vmem:[#allocation3 + $0x38] sm:$0xff]  ;;  %p1562_p4 = scmp.ne.s32.totalorder %s1142_s9, %s1561_s12  ;;  %p1566_p5 = scmp.lt.s32.totalorder %s1142_s9, %s1142_s9 }
  0x50   :  { %1358 = vmatpush3.bf16.msra.mxu0 %v1355_v5  ;;  %1366 = vmatprep.subr.bf16.mxu1 %v1621_v0  ;;  %v248_v16 = vld [vmem:[#allocation6] sm:$0xff]  ;;  %p1567_p6 = scmp.lt.s32.totalorder %s1561_s12, %s1561_s12 }
  0x51   :  { %1360 = vmatprep.subr.bf16.mxu0 %v1359_v10  ;;  %330 = vrot.lane.b32.xlu0 %v1178_v14, %s1624_s28  ;;  %v1774_v19 = vld [vmem:[%s1924_s4] ss:$0 sm:$0xff]  ;;  %s1625_s4 = smov 32  }
  0x52   :  { %v84_v62 = vld [vmem:[#allocation3 + $0x20] sm:$0xff]  ;;  %p1568_p7 = por %p1567_p6, %p1566_p5 }
  0x53   :  { %1368 = vmatpush3.bf16.msra.mxu1 %v1750_v15 }
  0x54   :  { %1362 = vmatpush3.bf16.msra.mxu0 %v1359_v10  ;;  %1369 = vmatprep.subr.bf16.mxu1 %v1621_v0  ;;  %p1569_p8 = pnand %p1568_p7, %p1562_p4 }
  0x55   :  { %1375 = vmatprep.subr.bf16.mxu0 %v1621_v0 }
  0x56   :  { %1276 = vmatmul.mubr.msk.f32.vlgmr.msra.gmra.mrb[0].mxu1 %vm99_vm1, %v248_v16 }
  0x57   :  { %1256 = vmatmul.mubr.msk.f32.vlgmr.msra.gmra.mrb[0].mxu0 %vm99_vm1, %v81_v17  ;;  %1371 = vmatpush3.bf16.msra.mxu1 %v1743_v9 }
  0x58   :  { %1286 = vmatprep.mubr.msk.f32.mxu1 %vm1622_vm0, %v1623_v1  ;;  %1372 = vmatprep.subr.bf16.mxu1 %v1621_v0 }
  0x59   :  { %1377 = vmatpush3.bf16.msra.mxu0 %v1743_v9  ;;  %1258 = vmatprep.mubr.msk.f32.mxu0 %vm99_vm1, %v82_v60 }
  0x5a   :  { %1378 = vmatprep.subr.bf16.mxu0 %v1621_v0 }
  0x5b   :  { %1374 = vmatpush3.bf16.msra.mxu1 %v1750_v15  ;;  %1259 = vmatmul.mubr.msk.f32.gmra.mrb[2].mxu0 %vm99_vm1, %v83_v61 }
  0x5c   :  { %1381 = vmatprep.subr.bf16.mxu1 %v1621_v0  ;;  %1261 = vmatprep.mubr.msk.f32.mxu0 %vm99_vm1, %v84_v62 }
  0x5d   :  { %1380 = vmatpush3.bf16.msra.mxu0 %v1750_v15 }
  0x5e   :  { %1387 = vmatprep.subr.bf16.mxu0 %v1621_v0 }
  0x5f   :  { %1262 = vmatmul.mubr.msk.f32.gmra.mrb[4].mxu0 %vm99_vm1, %v85_v63 }
  0x60   :  { %1264 = vmatprep.mubr.msk.f32.mxu0 %vm99_vm1, %v86_v2 }
  0x63   :  { %1265 = vmatmul.mubr.msk.f32.gmra.mrb[6].mxu0 %vm99_vm1, %v87_v3 }
  0x64   :  { %1297 = vmatprep.mubr.msk.f32.mxu0 %vm1622_vm0, %v1623_v1 }
  0xc3   :  { %v1769_v18 = vpop.permute.xlu0 %330 }
 0x129   :  { %v319_v20 = vpop.f32.mrb[0].mxu1 }
 0x12a   :  { %v1257_v21 = vpop.f32.mrb[0].mxu0  ;;  %v333_v22 = vadd.f32 %v1769_v18, %v319_v20  ;;  %v1277_v24 = vpop.f32.mrb[1].mxu1 }
 0x12b   :  { %v196_v23 = vadd.f32 %v1257_v21, %v1774_v19  ;;  %v190_v25 = vpop.f32.mrb[1].mxu0 }
 0x12c   :  { %v191_v26 = vadd.f32 %v1774_v19, %v190_v25  ;;  %335 = vrot.lane.b32.xlu0 %v333_v22, %s1624_s28 }
 0x12d   :  { %231 = vst.msk [vmem:[#allocation2 + $0x8] sm:$0xff] %vm229_vm2, %v196_v23 }
 0x12e   :  { %230 = vst.msk [vmem:[#allocation2] sm:$0xff] %vm229_vm2, %v191_v26  ;;  %v1260_v8 = vpop.f32.mrb[2].mxu0 }
 0x12f   :  { %v206_v10 = vadd.f32 %v1260_v8, %v1774_v19  ;;  %v200_v11 = vpop.f32.mrb[3].mxu0 }
 0x130   :  { %v201_v12 = vadd.f32 %v1774_v19, %v200_v11 }
 0x131   :  { %233 = vst.msk [vmem:[#allocation2 + $0x18] sm:$0xff] %vm229_vm2, %v206_v10 }
 0x132   :  { %232 = vst.msk [vmem:[#allocation2 + $0x10] sm:$0xff] %vm229_vm2, %v201_v12  ;;  %v1263_v13 = vpop.f32.mrb[4].mxu0 }
 0x133   :  { %v216_v14 = vadd.f32 %v1263_v13, %v1774_v19 }
 0x134   :  { %v366_v48 = vld [vmem:[#allocation2 + $0x8] sm:$0xff] }
 0x135   :  { %v249_v27 = vld [vmem:[#allocation2] sm:$0xff]  ;;  %235 = vst.msk [vmem:[#allocation2 + $0x28] sm:$0xff] %vm229_vm2, %v216_v14 }
 0x136   :  { %v323_v28 = vadd.f32 %v319_v20, %v249_v27 }
 0x138   :  { %v1180_v29 = vmul.f32 -1.442695, %v323_v28 }
 0x13a   :  { %1425 = vpow2.f32 %v1180_v29 }
 0x144   :  { %v1426_v30 = vpop.eup %1425 }
 0x145   :  { %v327_v31 = vadd.f32 1.0, %v1426_v30 }
 0x147   :  { %1427 = vrcp.f32 %v327_v31 }
 0x151   :  { %v1428_v32 = vpop.eup %1427 }
 0x19e   :  { %v336_v33 = vpop.permute.xlu0 %335 }
 0x19f   :  { %v338_v34 = vmul.f32 %v1428_v32, %v336_v33 }
 0x1a1   :  { %340 = vrot.lane.b32.xlu1 %v338_v34, %s1624_s28 }
 0x213   :  { %v341_v35 = vpop.permute.xlu1 %340 }
 0x214   :  { %v343_v36 = vadd.f32 %v341_v35, %v249_v27  ;;  %v476_v27 = vld [vmem:[#allocation2 + $0x10] sm:$0xff] }
 0x216   :  { %1429 = vtanh.f32 %v343_v36 }
 0x220   :  { %v1430_v37 = vpop.eup %1429 }
 0x221   :  { %346 = vrot.lane.b32.xlu1 %v1430_v37, %s1624_s28 }
 0x293   :  { %v347_v38 = vpop.permute.xlu1 %346 }
 0x294   :  { %v349_v39 = vsub.f32 %v248_v16, %v347_v38  ;;  %v210_v16 = vpop.f32.mrb[5].mxu0 }
 0x295   :  { %v211_v17 = vadd.f32 %v1774_v19, %v210_v16  ;;  %v1266_v20 = vpop.f32.mrb[6].mxu0 }
 0x296   :  { %351 = vrot.lane.b32.xlu0 %v349_v39, %s1625_s4  ;;  %v226_v21 = vadd.f32 %v1266_v20, %v1774_v19  ;;  %v220_v22 = vpop.f32.mrb[7].mxu0 }
 0x297   :  { %234 = vst.msk [vmem:[#allocation2 + $0x20] sm:$0xff] %vm229_vm2, %v211_v17  ;;  %v221_v23 = vadd.f32 %v1774_v19, %v220_v22 }
 0x298   :  { %237 = vst.msk [vmem:[#allocation2 + $0x38] sm:$0xff] %vm229_vm2, %v226_v21 }
 0x299   :  { %236 = vst.msk [vmem:[#allocation2 + $0x30] sm:$0xff] %vm229_vm2, %v221_v23 }
 0x308   :  { %v352_v40 = vpop.permute.xlu0 %351 }
 0x309   :  { %v354_v41 = vmul.f32 %v1428_v32, %v352_v40 }
 0x30b   :  { %356 = vrot.lane.b32.xlu1 %v354_v41, %s1625_s4 }
 0x37d   :  { %v357_v42 = vpop.permute.xlu1 %356 }
 0x37e   :  { %v359_v43 = vadd.f32 %v1430_v37, %v357_v42 }
 0x380   :  { %361 = vrot.lane.b32.xlu0 %v359_v43, %s1624_s28 }
 0x3f2   :  { %v362_v44 = vpop.permute.xlu0 %361 }
 0x3f3   :  { %364 = vst.msk [vmem:[#allocation11] sm:$0xff] %vm99_vm1, %v362_v44  ;;  %1287 = vmatmul.mubr.msk.f32.vlgmr.msra.gmra.mrb[2].mxu1 %vm99_vm1, %v362_v44 }
 0x3f4   :  { %1383 = vmatpush3.bf16.msra.mxu1 %v1743_v9  ;;  %1308 = vmatprep.mubr.msk.f32.mxu1 %vm1622_vm0, %v1623_v1 }
 0x3f5   :  { %1384 = vmatprep.subr.bf16.mxu1 %v1621_v0 }
 0x3f8   :  { %1386 = vmatpush3.bf16.msra.mxu1 %v1750_v15 }
 0x3f9   :  { %1393 = vmatprep.subr.bf16.mxu1 %v1621_v0 }
 0x4c6   :  { %v435_v45 = vpop.f32.mrb[2].mxu1 }
 0x4c7   :  { %v446_v46 = vadd.f32 %v435_v45, %v1769_v18  ;;  %v1288_v47 = vpop.f32.mrb[3].mxu1  ;;  %v439_v49 = vadd.f32 %v435_v45, %v366_v48 }
 0x4c8   :  { %v586_v47 = vld [vmem:[#allocation2 + $0x18] sm:$0xff] }
 0x4c9   :  { %448 = vrot.lane.b32.xlu1 %v446_v46, %s1624_s28  ;;  %v1182_v50 = vmul.f32 -1.442695, %v439_v49 }
 0x4cb   :  { %1431 = vpow2.f32 %v1182_v50 }
 0x4d5   :  { %v1432_v51 = vpop.eup %1431 }
 0x4d6   :  { %v443_v52 = vadd.f32 1.0, %v1432_v51 }
 0x4d8   :  { %1433 = vrcp.f32 %v443_v52 }
 0x4e2   :  { %v1434_v53 = vpop.eup %1433 }
 0x53b   :  { %v449_v54 = vpop.permute.xlu1 %448 }
 0x53c   :  { %v451_v55 = vmul.f32 %v1434_v53, %v449_v54 }
 0x53e   :  { %453 = vrot.lane.b32.xlu0 %v451_v55, %s1624_s28 }
 0x5b0   :  { %v454_v56 = vpop.permute.xlu0 %453 }
 0x5b1   :  { %v456_v57 = vadd.f32 %v454_v56, %v366_v48 }
 0x5b3   :  { %1435 = vtanh.f32 %v456_v57 }
 0x5bd   :  { %v1436_v58 = vpop.eup %1435 }
 0x5be   :  { %v458_v59 = vsub.f32 %v359_v43, %v1436_v58 }
 0x5c0   :  { %460 = vrot.lane.b32.xlu1 %v458_v59, %s1626_s30 }
 0x632   :  { %v461_v4 = vpop.permute.xlu1 %460 }
 0x633   :  { %v463_v5 = vmul.f32 %v1434_v53, %v461_v4 }
 0x635   :  { %465 = vrot.lane.b32.xlu0 %v463_v5, %s1625_s4  ;;  %v696_v5 = vld [vmem:[#allocation2 + $0x20] sm:$0xff] }
 0x6a7   :  { %v466_v6 = vpop.permute.xlu0 %465 }
 0x6a8   :  { %v468_v7 = vadd.f32 %v1436_v58, %v466_v6 }
 0x6aa   :  { %470 = vrot.lane.b32.xlu1 %v468_v7, %s1624_s28 }
 0x71c   :  { %v471_v24 = vpop.permute.xlu1 %470 }
 0x71d   :  { %474 = vst.msk [vmem:[#allocation11 + $0x8] sm:$0xff] %vm99_vm1, %v471_v24  ;;  %1298 = vmatmul.mubr.msk.f32.vlgmr.msra.gmra.mrb[8].mxu0 %vm99_vm1, %v471_v24 }
 0x71e   :  { %1389 = vmatpush3.bf16.msra.mxu0 %v1743_v9  ;;  %1319 = vmatprep.mubr.msk.f32.mxu0 %vm1622_vm0, %v1623_v1 }
 0x71f   :  { %1390 = vmatprep.subr.bf16.mxu0 %v1621_v0 }
 0x722   :  { %1392 = vmatpush3.bf16.msra.mxu0 %v1750_v15 }
 0x723   :  { %1399 = vmatprep.subr.bf16.mxu0 %v1621_v0 }
 0x7f0   :  { %v545_v19 = vpop.f32.mrb[8].mxu0 }
 0x7f1   :  { %v556_v25 = vadd.f32 %v545_v19, %v1769_v18  ;;  %v1299_v26 = vpop.f32.mrb[9].mxu0  ;;  %v549_v28 = vadd.f32 %v545_v19, %v476_v27 }
 0x7f3   :  { %558 = vrot.lane.b32.xlu0 %v556_v25, %s1624_s28  ;;  %v1184_v29 = vmul.f32 -1.442695, %v549_v28  ;;  %v806_v28 = vld [vmem:[#allocation2 + $0x28] sm:$0xff] }
 0x7f5   :  { %1437 = vpow2.f32 %v1184_v29 }
 0x7ff   :  { %v1438_v30 = vpop.eup %1437 }
 0x800   :  { %v553_v31 = vadd.f32 1.0, %v1438_v30 }
 0x802   :  { %1439 = vrcp.f32 %v553_v31 }
 0x80c   :  { %v1440_v32 = vpop.eup %1439 }
 0x865   :  { %v559_v33 = vpop.permute.xlu0 %558 }
 0x866   :  { %v561_v34 = vmul.f32 %v1440_v32, %v559_v33 }
 0x868   :  { %563 = vrot.lane.b32.xlu1 %v561_v34, %s1624_s28 }
 0x8da   :  { %v564_v35 = vpop.permute.xlu1 %563 }
 0x8db   :  { %v566_v36 = vadd.f32 %v564_v35, %v476_v27 }
 0x8dd   :  { %1441 = vtanh.f32 %v566_v36 }
 0x8e7   :  { %v1442_v37 = vpop.eup %1441 }
 0x8e8   :  { %v568_v38 = vsub.f32 %v468_v7, %v1442_v37 }
 0x8ea   :  { %570 = vrot.lane.b32.xlu0 %v568_v38, %s1626_s30 }
 0x95c   :  { %v571_v39 = vpop.permute.xlu0 %570 }
 0x95d   :  { %v573_v40 = vmul.f32 %v1440_v32, %v571_v39 }
 0x95f   :  { %575 = vrot.lane.b32.xlu1 %v573_v40, %s1625_s4 }
 0x9d1   :  { %v576_v41 = vpop.permute.xlu1 %575 }
 0x9d2   :  { %v578_v42 = vadd.f32 %v1442_v37, %v576_v41 }
 0x9d4   :  { %580 = vrot.lane.b32.xlu0 %v578_v42, %s1624_s28 }
 0xa46   :  { %v581_v43 = vpop.permute.xlu0 %580 }
 0xa47   :  { %584 = vst.msk [vmem:[#allocation11 + $0x10] sm:$0xff] %vm99_vm1, %v581_v43  ;;  %1309 = vmatmul.mubr.msk.f32.vlgmr.msra.gmra.mrb[4].mxu1 %vm99_vm1, %v581_v43 }
 0xa48   :  { %1395 = vmatpush3.bf16.msra.mxu1 %v1743_v9  ;;  %1330 = vmatprep.mubr.msk.f32.mxu1 %vm1622_vm0, %v1623_v1 }
 0xa49   :  { %1396 = vmatprep.subr.bf16.mxu1 %v1621_v0 }
 0xa4c   :  { %1398 = vmatpush3.bf16.msra.mxu1 %v1750_v15 }
 0xa4d   :  { %1405 = vmatprep.subr.bf16.mxu1 %v1621_v0 }
 0xb1a   :  { %v655_v44 = vpop.f32.mrb[4].mxu1 }
 0xb1b   :  { %v666_v45 = vadd.f32 %v655_v44, %v1769_v18  ;;  %v1310_v46 = vpop.f32.mrb[5].mxu1  ;;  %v659_v48 = vadd.f32 %v655_v44, %v586_v47  ;;  %v916_v44 = vld [vmem:[#allocation2 + $0x30] sm:$0xff] }
 0xb1d   :  { %668 = vrot.lane.b32.xlu1 %v666_v45, %s1624_s28  ;;  %v1186_v49 = vmul.f32 -1.442695, %v659_v48 }
 0xb1f   :  { %1443 = vpow2.f32 %v1186_v49 }
 0xb29   :  { %v1444_v50 = vpop.eup %1443 }
 0xb2a   :  { %v663_v51 = vadd.f32 1.0, %v1444_v50 }
 0xb2c   :  { %1445 = vrcp.f32 %v663_v51 }
 0xb36   :  { %v1446_v52 = vpop.eup %1445 }
 0xb8f   :  { %v669_v53 = vpop.permute.xlu1 %668 }
 0xb90   :  { %v671_v54 = vmul.f32 %v1446_v52, %v669_v53 }
 0xb92   :  { %673 = vrot.lane.b32.xlu0 %v671_v54, %s1624_s28 }
 0xc04   :  { %v674_v55 = vpop.permute.xlu0 %673 }
 0xc05   :  { %v676_v56 = vadd.f32 %v674_v55, %v586_v47 }
 0xc07   :  { %1447 = vtanh.f32 %v676_v56 }
 0xc11   :  { %v1448_v57 = vpop.eup %1447 }
 0xc12   :  { %v678_v58 = vsub.f32 %v578_v42, %v1448_v57 }
 0xc14   :  { %680 = vrot.lane.b32.xlu1 %v678_v58, %s1626_s30 }
 0xc86   :  { %v681_v59 = vpop.permute.xlu1 %680 }
 0xc87   :  { %v683_v60 = vmul.f32 %v1446_v52, %v681_v59 }
 0xc89   :  { %685 = vrot.lane.b32.xlu0 %v683_v60, %s1625_s4 }
 0xcfb   :  { %v686_v61 = vpop.permute.xlu0 %685 }
 0xcfc   :  { %v688_v62 = vadd.f32 %v1448_v57, %v686_v61 }
 0xcfe   :  { %690 = vrot.lane.b32.xlu1 %v688_v62, %s1624_s28 }
 0xd70   :  { %v691_v63 = vpop.permute.xlu1 %690 }
 0xd71   :  { %694 = vst.msk [vmem:[#allocation11 + $0x18] sm:$0xff] %vm99_vm1, %v691_v63  ;;  %1320 = vmatmul.mubr.msk.f32.vlgmr.msra.gmra.mrb[10].mxu0 %vm99_vm1, %v691_v63 }
 0xd72   :  { %1401 = vmatpush3.bf16.msra.mxu0 %v1743_v9  ;;  %1341 = vmatprep.mubr.msk.f32.mxu0 %vm1622_vm0, %v1623_v1 }
 0xd73   :  { %1402 = vmatprep.subr.bf16.mxu0 %v1621_v0 }
 0xd76   :  { %1404 = vmatpush3.bf16.msra.mxu0 %v1750_v15 }
 0xe44   :  { %v765_v2 = vpop.f32.mrb[10].mxu0 }
 0xe45   :  { %v776_v3 = vadd.f32 %v765_v2, %v1769_v18  ;;  %v1321_v4 = vpop.f32.mrb[11].mxu0  ;;  %v769_v6 = vadd.f32 %v765_v2, %v696_v5  ;;  %v1026_v2 = vld [vmem:[#allocation2 + $0x38] sm:$0xff] }
 0xe47   :  { %778 = vrot.lane.b32.xlu0 %v776_v3, %s1624_s28  ;;  %v1188_v7 = vmul.f32 -1.442695, %v769_v6 }
 0xe49   :  { %1449 = vpow2.f32 %v1188_v7 }
 0xe53   :  { %v1450_v8 = vpop.eup %1449 }
 0xe54   :  { %v773_v10 = vadd.f32 1.0, %v1450_v8 }
 0xe56   :  { %1451 = vrcp.f32 %v773_v10 }
 0xe60   :  { %v1452_v11 = vpop.eup %1451 }
 0xeb9   :  { %v779_v12 = vpop.permute.xlu0 %778 }
 0xeba   :  { %v781_v13 = vmul.f32 %v1452_v11, %v779_v12 }
 0xebc   :  { %783 = vrot.lane.b32.xlu1 %v781_v13, %s1624_s28 }
 0xf2e   :  { %v784_v14 = vpop.permute.xlu1 %783 }
 0xf2f   :  { %v786_v16 = vadd.f32 %v784_v14, %v696_v5 }
 0xf31   :  { %1453 = vtanh.f32 %v786_v16 }
 0xf3b   :  { %v1454_v17 = vpop.eup %1453 }
 0xf3c   :  { %v788_v20 = vsub.f32 %v688_v62, %v1454_v17 }
 0xf3e   :  { %790 = vrot.lane.b32.xlu0 %v788_v20, %s1626_s30 }
 0xfb0   :  { %v791_v21 = vpop.permute.xlu0 %790 }
 0xfb1   :  { %v793_v22 = vmul.f32 %v1452_v11, %v791_v21 }
 0xfb3   :  { %795 = vrot.lane.b32.xlu1 %v793_v22, %s1625_s4 }
0x1025   :  { %v796_v23 = vpop.permute.xlu1 %795 }
0x1026   :  { %v798_v24 = vadd.f32 %v1454_v17, %v796_v23 }
0x1028   :  { %800 = vrot.lane.b32.xlu0 %v798_v24, %s1624_s28 }
0x109a   :  { %v801_v19 = vpop.permute.xlu0 %800 }
0x109b   :  { %804 = vst.msk [vmem:[#allocation11 + $0x20] sm:$0xff] %vm99_vm1, %v801_v19  ;;  %1331 = vmatmul.mubr.msk.f32.vlgmr.msra.gmra.mrb[6].mxu1 %vm99_vm1, %v801_v19 }
0x109c   :  { %1407 = vmatpush3.bf16.msra.mxu1 %v1743_v9  ;;  %1352 = vmatprep.mubr.msk.f32.mxu1 %vm1622_vm0, %v1623_v1 }
0x109d   :  { %1408 = vmatprep.subr.bf16.mxu1 %v1621_v0 }
0x10a0   :  { %1410 = vmatpush3.bf16.msra.mxu1 %v1750_v15 }
0x116e   :  { %v875_v25 = vpop.f32.mrb[6].mxu1 }
0x116f   :  { %v886_v26 = vadd.f32 %v875_v25, %v1769_v18  ;;  %v1332_v27 = vpop.f32.mrb[7].mxu1  ;;  %v879_v29 = vadd.f32 %v875_v25, %v806_v28 }
0x1171   :  { %888 = vrot.lane.b32.xlu1 %v886_v26, %s1624_s28  ;;  %v1190_v30 = vmul.f32 -1.442695, %v879_v29 }
0x1173   :  { %1455 = vpow2.f32 %v1190_v30 }
0x117d   :  { %v1456_v31 = vpop.eup %1455 }
0x117e   :  { %v883_v32 = vadd.f32 1.0, %v1456_v31 }
0x1180   :  { %1457 = vrcp.f32 %v883_v32 }
0x118a   :  { %v1458_v9 = vpop.eup %1457 }
0x11e3   :  { %v889_v33 = vpop.permute.xlu1 %888 }
0x11e4   :  { %v891_v1 = vmul.f32 %v1458_v9, %v889_v33 }
0x11e6   :  { %893 = vrot.lane.b32.xlu0 %v891_v1, %s1624_s28 }
0x1258   :  { %v894_v0 = vpop.permute.xlu0 %893 }
0x1259   :  { %v896_v15 = vadd.f32 %v894_v0, %v806_v28 }
0x125b   :  { %1459 = vtanh.f32 %v896_v15 }
0x1265   :  { %v1460_v34 = vpop.eup %1459 }
0x1266   :  { %v898_v35 = vsub.f32 %v798_v24, %v1460_v34 }
0x1268   :  { %900 = vrot.lane.b32.xlu1 %v898_v35, %s1626_s30 }
0x12da   :  { %v901_v36 = vpop.permute.xlu1 %900 }
0x12db   :  { %v903_v37 = vmul.f32 %v1458_v9, %v901_v36 }
0x12dd   :  { %905 = vrot.lane.b32.xlu0 %v903_v37, %s1625_s4 }
0x134f   :  { %v906_v38 = vpop.permute.xlu0 %905 }
0x1350   :  { %v908_v39 = vadd.f32 %v1460_v34, %v906_v38 }
0x1352   :  { %910 = vrot.lane.b32.xlu1 %v908_v39, %s1624_s28 }
0x13c4   :  { %v911_v40 = vpop.permute.xlu1 %910 }
0x13c5   :  { %914 = vst.msk [vmem:[#allocation11 + $0x28] sm:$0xff] %vm99_vm1, %v911_v40  ;;  %1342 = vmatmul.mubr.msk.f32.vlgmr.msra.gmra.mrb[12].mxu0 %vm99_vm1, %v911_v40 }
0x1498   :  { %v985_v41 = vpop.f32.mrb[12].mxu0 }
0x1499   :  { %v996_v42 = vadd.f32 %v985_v41, %v1769_v18  ;;  %v1343_v43 = vpop.f32.mrb[13].mxu0  ;;  %v989_v45 = vadd.f32 %v985_v41, %v916_v44 }
0x149b   :  { %998 = vrot.lane.b32.xlu0 %v996_v42, %s1624_s28  ;;  %v1192_v46 = vmul.f32 -1.442695, %v989_v45 }
0x149d   :  { %1461 = vpow2.f32 %v1192_v46 }
0x14a7   :  { %v1462_v47 = vpop.eup %1461 }
0x14a8   :  { %v993_v48 = vadd.f32 1.0, %v1462_v47 }
0x14aa   :  { %1463 = vrcp.f32 %v993_v48 }
0x14b4   :  { %v1464_v49 = vpop.eup %1463 }
0x150d   :  { %v999_v50 = vpop.permute.xlu0 %998 }
0x150e   :  { %v1001_v51 = vmul.f32 %v1464_v49, %v999_v50 }
0x1510   :  { %1003 = vrot.lane.b32.xlu1 %v1001_v51, %s1624_s28 }
0x1582   :  { %v1004_v52 = vpop.permute.xlu1 %1003 }
0x1583   :  { %v1006_v53 = vadd.f32 %v1004_v52, %v916_v44 }
0x1585   :  { %1465 = vtanh.f32 %v1006_v53 }
0x158f   :  { %v1466_v54 = vpop.eup %1465 }
0x1590   :  { %v1008_v55 = vsub.f32 %v908_v39, %v1466_v54 }
0x1592   :  { %1010 = vrot.lane.b32.xlu0 %v1008_v55, %s1626_s30 }
0x1604   :  { %v1011_v56 = vpop.permute.xlu0 %1010 }
0x1605   :  { %v1013_v57 = vmul.f32 %v1464_v49, %v1011_v56 }
0x1607   :  { %1015 = vrot.lane.b32.xlu1 %v1013_v57, %s1625_s4 }
0x1679   :  { %v1016_v58 = vpop.permute.xlu1 %1015 }
0x167a   :  { %v1018_v59 = vadd.f32 %v1466_v54, %v1016_v58 }
0x167c   :  { %1020 = vrot.lane.b32.xlu0 %v1018_v59, %s1624_s28 }
0x16ee   :  { %v1021_v60 = vpop.permute.xlu0 %1020 }
0x16ef   :  { %1024 = vst.msk [vmem:[#allocation11 + $0x30] sm:$0xff] %vm99_vm1, %v1021_v60  ;;  %1353 = vmatmul.mubr.msk.f32.vlgmr.msra.gmra.mrb[8].mxu1 %vm99_vm1, %v1021_v60 }
0x17c2   :  { %v1095_v61 = vpop.f32.mrb[8].mxu1 }
0x17c3   :  { %v1106_v62 = vadd.f32 %v1095_v61, %v1769_v18  ;;  %v1354_v63 = vpop.f32.mrb[9].mxu1  ;;  %v1099_v3 = vadd.f32 %v1095_v61, %v1026_v2 }
0x17c5   :  { %1108 = vrot.lane.b32.xlu1 %v1106_v62, %s1624_s28  ;;  %v1194_v4 = vmul.f32 -1.442695, %v1099_v3 }
0x17c7   :  { %1467 = vpow2.f32 %v1194_v4 }
0x17d1   :  { %v1468_v5 = vpop.eup %1467 }
0x17d2   :  { %v1103_v6 = vadd.f32 1.0, %v1468_v5 }
0x17d4   :  { %1469 = vrcp.f32 %v1103_v6 }
0x17de   :  { %v1470_v7 = vpop.eup %1469 }
0x1837   :  { %v1109_v8 = vpop.permute.xlu1 %1108 }
0x1838   :  { %v1111_v10 = vmul.f32 %v1470_v7, %v1109_v8 }
0x183a   :  { %1113 = vrot.lane.b32.xlu0 %v1111_v10, %s1624_s28 }
0x18ac   :  { %v1114_v11 = vpop.permute.xlu0 %1113 }
0x18ad   :  { %v1116_v12 = vadd.f32 %v1114_v11, %v1026_v2 }
0x18af   :  { %1471 = vtanh.f32 %v1116_v12 }
0x18b9   :  { %v1472_v13 = vpop.eup %1471 }
0x18ba   :  { %v1118_v18 = vsub.f32 %v1018_v59, %v1472_v13 }
0x18bc   :  { %1120 = vrot.lane.b32.xlu1 %v1118_v18, %s1626_s30 }
0x192e   :  { %v1121_v14 = vpop.permute.xlu1 %1120 }
0x192f   :  { %v1123_v16 = vmul.f32 %v1470_v7, %v1121_v14 }
0x1931   :  { %1125 = vrot.lane.b32.xlu0 %v1123_v16, %s1625_s4 }
0x19a3   :  { %v1126_v17 = vpop.permute.xlu0 %1125 }
0x19a4   :  { %v1128_v20 = vadd.f32 %v1472_v13, %v1126_v17 }
0x19a6   :  { %1130 = vrot.lane.b32.xlu1 %v1128_v20, %s1624_s28 }
0x1a18   :  { %v1131_v21 = vpop.permute.xlu1 %1130 }
0x1a19   :  { %1134 = vst.msk [vmem:[#allocation11 + $0x38] sm:$0xff] %vm99_vm1, %v1131_v21  ;;  %1135 = vst.msk [vmem:[#allocation12] sm:$0xff] %vm99_vm1, %v1131_v21 }
0x1a1a   :  { %1572 = shalt.err (!%p1569_p8)
}
0x1a1b   :  { %s1573_s0 = scalar_lea.hbm %s1926_s6, 1024 }
0x1a1c   :  { %p1574_p9 = scmp.ne.s32.totalorder %s1926_s6, %s1573_s0  ;;  %p1577_p10 = scmp.lt.u32.totalorder %s1573_s0, %s1926_s6 }
0x1a1e   :  { %p1579_p11 = pnand %p1577_p10, %p1574_p9 }
0x1a20   :  { %1582 = shalt.err (!%p1579_p11)
}
0x1a21   :  { %1147 = dma.vmem_to_hbm [thread:$0]  %s1142_s9, 1024, %s1926_s6, [#allocation5], %s1617_s1, %s1617_s1, %s1618_s23  }
0x1a22   :  { %s1583_s20 = scalar_lea.vmem %s1155_s11, 128  ;;  %p1588_p13 = scmp.lt.s32.totalorder %s1155_s11, %s1155_s11 }
0x1a23   :  { %p1584_p12 = scmp.ne.s32.totalorder %s1155_s11, %s1583_s20  ;;  %p1589_p0 = scmp.lt.s32.totalorder %s1583_s20, %s1583_s20 }
0x1a25   :  { %p1590_p1 = por %p1589_p0, %p1588_p13 }
0x1a27   :  { %p1591_p2 = pnand %p1590_p1, %p1584_p12 }
0x1a29   :  { %1594 = shalt.err (!%p1591_p2)
}
0x1a2a   :  { %s1595_s24 = scalar_lea.hbm %s1927_s7, 128 }
0x1a2b   :  { %p1596_p3 = scmp.ne.s32.totalorder %s1927_s7, %s1595_s24  ;;  %p1599_p4 = scmp.lt.u32.totalorder %s1595_s24, %s1927_s7 }
0x1a2d   :  { %p1601_p5 = pnand %p1599_p4, %p1596_p3 }
0x1a2f   :  { %1604 = shalt.err (!%p1601_p5)
}
0x1a30   :  { %1157 = dma.vmem_to_hbm [thread:$0]  %s1155_s11, 128, %s1927_s7, [#allocation13]  }
0x1a31   :  { %1611 = dma.done.wait [#allocation5], 1024  }
0x1a32   :  { %1612 = vsyncadd [#allocation5], 4294966272 }
0x1a33   :  { %1613 = dma.done.wait [#allocation13], 128  }
0x1a34   :  { %1614 = vsyncadd [#allocation13], 4294967168 }
0x1a35   :  { %1164 = vsyncpa [#allocation4], 1 }
0x1a36   :  { %1165 = vsyncpa [#allocation7], 1 }
0x1a37   :  { %1166 = vsyncpa [#allocation10], 1 }
0x1a38   :  { %1167 = vsyncpa [#allocation5], 1 }
0x1a39   :  { %1168 = vsyncpa [#allocation13], 1 }

</bundles_post_ra>
